<compile_context>
chip_gen: v7x
topology: tpu7x:2x2x1
jax: 0.10.0
libtpu: 0.0.40
codegen_flags: <defaults>
</compile_context>

<pallas_src>
import functools

import jax
import jax.numpy as jnp
from jax.experimental import pallas as pl
from jax.experimental.pallas import tpu as pltpu

EPS = 1e-5
_LANE = 128


def _block_config():
    """Per-generation (target input-block bytes, vmem_limit_bytes)."""
    try:
        vmem = pltpu.get_tpu_info().vmem_capacity_bytes
    except Exception:
        vmem = 64 * 1024 * 1024                  # assume smallest (v7x-like) budget
    if vmem >= 100 * 1024 * 1024:                # v5e / v6e: 128 MiB physical VMEM
        return 6 * 1024 * 1024, 96 * 1024 * 1024
    # v7x: 64 MiB per TensorCore -- keep blocks and the scoped limit modest.
    return 4 * 1024 * 1024, 48 * 1024 * 1024


_TARGET_BLOCK_BYTES, _VMEM_LIMIT_BYTES = _block_config()


def _ln_withbias_kernel(x_ref, w_ref, b_ref, o_ref):
    x = x_ref[...].astype(jnp.float32)                     # (1, C, T)
    c = x.shape[1]
    mu = jnp.sum(x, axis=1, keepdims=True) * (1.0 / c)     # (1, 1, T)
    xc = x - mu
    var = jnp.sum(xc * xc, axis=1, keepdims=True) * (1.0 / c)
    inv = jax.lax.rsqrt(var + EPS)
    w = w_ref[...].astype(jnp.float32)                     # (C, 1) broadcasts over lanes
    b = b_ref[...].astype(jnp.float32)                     # (C, 1)
    o_ref[...] = (xc * inv * w + b).astype(o_ref.dtype)


def _ln_biasfree_kernel(x_ref, w_ref, o_ref):
    x = x_ref[...].astype(jnp.float32)                     # (1, C, T)
    c = x.shape[1]
    # One-pass stats: BiasFree scales the *uncentered* x, so no centered copy
    # is needed. Clamp var against tiny negative values from cancellation.
    mu = jnp.sum(x, axis=1, keepdims=True) * (1.0 / c)
    ex2 = jnp.sum(x * x, axis=1, keepdims=True) * (1.0 / c)
    var = jnp.maximum(ex2 - mu * mu, 0.0)
    inv = jax.lax.rsqrt(var + EPS)
    w = w_ref[...].astype(jnp.float32)                     # (C, 1)
    o_ref[...] = (x * inv * w).astype(o_ref.dtype)


def _pick_spatial_tile(hw, c, itemsize, b):
    """Lane-dim tile: 128-multiple, sized off the sublane-padded block bytes."""
    sub = max(8, 32 // max(1, itemsize))         # f32->8, bf16->16, 8-bit->32 sublanes
    c_pad = -(-c // sub) * sub                   # physical sublane footprint of C
    t = (_TARGET_BLOCK_BYTES // max(1, c_pad * itemsize)) // _LANE * _LANE
    t = max(t, _LANE)
    hw_lanes = -(-hw // _LANE)                   # spatial extent in 128-lane units
    t = min(t, hw_lanes * _LANE)                 # never tile past the extent
    # v7x megacore occupancy: aim for >= 4 grid steps when the image can be
    # split (pure occupancy fix; harmless extra steps on single-TC v5e/v6e).
    min_steps = 4
    if b * (-(-hw // t)) < min_steps:
        per_b = -(-min_steps // b)               # spatial tiles wanted per batch
        t_cap = -(-hw_lanes // per_b) * _LANE
        t = max(_LANE, min(t, t_cap))
    return t


@functools.partial(jax.jit, static_argnames=("layer_norm_type",))
def layer_norm(x, weight, bias=None, *, layer_norm_type="WithBias"):
    """x: NCHW array. weight (and bias for WithBias): (C,). Returns NCHW."""
    b, c, h, w = x.shape
    hw = h * w
    itemsize = jnp.dtype(x.dtype).itemsize
    t = _pick_spatial_tile(hw, c, itemsize, b)

    # NCHW -> (B, C, HW): contiguous reshape, no transpose / extra HBM pass.
    x3 = x.reshape(b, c, hw)

    x_spec = pl.BlockSpec((1, c, t), lambda bi, si: (bi, 0, si))
    p_spec = pl.BlockSpec((c, 1), lambda bi, si: (0, 0))
    w2 = weight.reshape(c, 1)

    if layer_norm_type == "BiasFree":
        kernel = _ln_biasfree_kernel
        operands = (x3, w2)
        in_specs = [x_spec, p_spec]
    else:
        # Matches the PyTorch module: anything other than 'BiasFree' is WithBias.
        if bias is None:
            raise ValueError("WithBias LayerNorm requires a bias parameter.")
        kernel = _ln_withbias_kernel
        operands = (x3, w2, bias.reshape(c, 1))
        in_specs = [x_spec, p_spec, p_spec]

    out3 = pl.pallas_call(
        kernel,
        out_shape=jax.ShapeDtypeStruct((b, c, hw), x.dtype),
        grid_spec=pltpu.PrefetchScalarGridSpec(
            num_scalar_prefetch=0,
            grid=(b, pl.cdiv(hw, t)),            # partial last block is masked by Pallas
            in_specs=in_specs,
            out_specs=x_spec,
        ),
        compiler_params=pltpu.CompilerParams(
            dimension_semantics=("parallel", "parallel"),
            vmem_limit_bytes=_VMEM_LIMIT_BYTES,
        ),
    )(*operands)

    # (B, C, HW) -> NCHW: contiguous reshape.
    return out3.reshape(b, c, h, w)


def _reference(x, weight, bias, layer_norm_type):
    # Pure-JAX reference mirroring the PyTorch module (to_3d -> norm -> to_4d).
    b, c, h, w = x.shape
    x3 = jnp.transpose(x, (0, 2, 3, 1)).reshape(b, h * w, c).astype(jnp.float32)
    mu = jnp.mean(x3, axis=-1, keepdims=True)
    var = jnp.mean((x3 - mu) ** 2, axis=-1, keepdims=True)
    wf = weight.astype(jnp.float32)
    if layer_norm_type == "BiasFree":
        y = x3 / jnp.sqrt(var + EPS) * wf
    else:
        y = (x3 - mu) / jnp.sqrt(var + EPS) * wf + bias.astype(jnp.float32)
    return jnp.transpose(y.reshape(b, h, w, c), (0, 3, 1, 2)).astype(x.dtype)


def _check(out, ref, atol, rtol):
    a = jnp.asarray(out, jnp.float32)
    r = jnp.asarray(ref, jnp.float32)
    assert bool(jnp.allclose(a, r, atol=atol, rtol=rtol)), float(jnp.max(jnp.abs(a - r)))


if __name__ == "__main__":
    key = jax.random.PRNGKey(0)
    kx, kw, kb, kx2, kw2, kb2, kx3 = jax.random.split(key, 7)

    # --- primary case: B=2, C=4, 16x16, f32, both variants -------------------
    B, C, H, W = 2, 4, 16, 16
    x = jax.random.normal(kx, (B, C, H, W), dtype=jnp.float32)
    weight = 1.0 + 0.1 * jax.random.normal(kw, (C,), dtype=jnp.float32)
    bias = 0.1 * jax.random.normal(kb, (C,), dtype=jnp.float32)

    out_wb = layer_norm(x, weight, bias, layer_norm_type="WithBias")
    jax.block_until_ready(out_wb)
    assert out_wb.shape == (B, C, H, W)
    _check(out_wb, _reference(x, weight, bias, "WithBias"), 1e-5, 1e-5)

    out_bf = layer_norm(x, weight, layer_norm_type="BiasFree")
    jax.block_until_ready(out_bf)
    _check(out_bf, _reference(x, weight, bias, "BiasFree"), 1e-5, 1e-5)

    # --- ragged spatial extent (HW=100, not 128-aligned), larger C, f32 ------
    B2, C2, H2, W2 = 1, 48, 10, 10
    x2 = jax.random.normal(kx2, (B2, C2, H2, W2), dtype=jnp.float32)
    w2 = 1.0 + 0.1 * jax.random.normal(kw2, (C2,), dtype=jnp.float32)
    b2 = 0.1 * jax.random.normal(kb2, (C2,), dtype=jnp.float32)
    out2 = layer_norm(x2, w2, b2, layer_norm_type="WithBias")
    jax.block_until_ready(out2)
    _check(out2, _reference(x2, w2, b2, "WithBias"), 1e-5, 1e-5)

    # --- bf16 input, ragged HW=144 --------------------------------------------
    B3, C3, H3, W3 = 2, 16, 12, 12
    x3 = jax.random.normal(kx3, (B3, C3, H3, W3), dtype=jnp.float32).astype(jnp.bfloat16)
    w3 = jnp.ones((C3,), dtype=jnp.bfloat16)
    b3 = jnp.zeros((C3,), dtype=jnp.bfloat16)
    out3 = layer_norm(x3, w3, b3, layer_norm_type="WithBias")
    jax.block_until_ready(out3)
    _check(out3, _reference(x3, w3, b3, "WithBias"), 3e-2, 3e-2)

    print("KERNEL_OK")
</pallas_src>

<mosaic_0001>
module attributes {stable_mosaic.version = 11 : i64} {
  func.func @_ln_withbias_kernel(%arg0: i32, %arg1: i32, %arg2: memref<1x4x128xf32, #tpu.memory_space<vmem>>, %arg3: memref<4x1xf32, #tpu.memory_space<vmem>>, %arg4: memref<4x1xf32, #tpu.memory_space<vmem>>, %arg5: memref<1x4x128xf32, #tpu.memory_space<vmem>>) attributes {dimension_semantics = [#tpu.dimension_semantics<parallel>, #tpu.dimension_semantics<parallel>], iteration_bounds = array<i64: 2, 2>, scalar_prefetch = 0 : i64, scratch_operands = 0 : i64, tpu.core_type = #tpu.core_type<tc>, window_params = [{transform_indices = @transform_0, window_bounds = array<i64: 1, 4, 128>}, {pipeline_mode = #tpu.pipeline_mode<synchronous>, transform_indices = @transform_1, window_bounds = array<i64: 4, 1>}, {pipeline_mode = #tpu.pipeline_mode<synchronous>, transform_indices = @transform_2, window_bounds = array<i64: 4, 1>}, {transform_indices = @transform_3, window_bounds = array<i64: 1, 4, 128>}]} {
    %c0 = arith.constant 0 : index
    %c0_0 = arith.constant 0 : index
    %c0_1 = arith.constant 0 : index
    %0 = vector.load %arg2[%c0, %c0_0, %c0_1] : memref<1x4x128xf32, #tpu.memory_space<vmem>>, vector<1x4x128xf32>
    %cst = arith.constant dense<0.000000e+00> : vector<1x128xf32>
    %1 = vector.multi_reduction <add>, %0, %cst [1] : vector<1x4x128xf32> to vector<1x128xf32>
    %2 = vector.shape_cast %1 : vector<1x128xf32> to vector<1x1x128xf32>
    %cst_2 = arith.constant 2.500000e-01 : f32
    %3 = vector.broadcast %cst_2 : f32 to vector<1x1x128xf32>
    %4 = arith.mulf %2, %3 : vector<1x1x128xf32>
    %5 = vector.broadcast %4 : vector<1x1x128xf32> to vector<1x4x128xf32>
    %6 = arith.subf %0, %5 : vector<1x4x128xf32>
    %7 = arith.mulf %6, %6 : vector<1x4x128xf32>
    %cst_3 = arith.constant dense<0.000000e+00> : vector<1x128xf32>
    %8 = vector.multi_reduction <add>, %7, %cst_3 [1] : vector<1x4x128xf32> to vector<1x128xf32>
    %9 = vector.shape_cast %8 : vector<1x128xf32> to vector<1x1x128xf32>
    %cst_4 = arith.constant 2.500000e-01 : f32
    %10 = vector.broadcast %cst_4 : f32 to vector<1x1x128xf32>
    %11 = arith.mulf %9, %10 : vector<1x1x128xf32>
    %cst_5 = arith.constant 9.99999974E-6 : f32
    %12 = vector.broadcast %cst_5 : f32 to vector<1x1x128xf32>
    %13 = arith.addf %11, %12 : vector<1x1x128xf32>
    %14 = math.rsqrt %13 : vector<1x1x128xf32>
    %c0_6 = arith.constant 0 : index
    %c0_7 = arith.constant 0 : index
    %15 = vector.load %arg3[%c0_6, %c0_7] : memref<4x1xf32, #tpu.memory_space<vmem>>, vector<4x1xf32>
    %c0_8 = arith.constant 0 : index
    %c0_9 = arith.constant 0 : index
    %16 = vector.load %arg4[%c0_8, %c0_9] : memref<4x1xf32, #tpu.memory_space<vmem>>, vector<4x1xf32>
    %17 = vector.broadcast %14 : vector<1x1x128xf32> to vector<1x4x128xf32>
    %18 = arith.mulf %6, %17 : vector<1x4x128xf32>
    %19 = vector.shape_cast %15 : vector<4x1xf32> to vector<1x4x1xf32>
    %20 = vector.broadcast %19 : vector<1x4x1xf32> to vector<1x4x128xf32>
    %21 = arith.mulf %18, %20 : vector<1x4x128xf32>
    %22 = vector.shape_cast %16 : vector<4x1xf32> to vector<1x4x1xf32>
    %23 = vector.broadcast %22 : vector<1x4x1xf32> to vector<1x4x128xf32>
    %24 = arith.addf %21, %23 : vector<1x4x128xf32>
    %c0_10 = arith.constant 0 : index
    %c0_11 = arith.constant 0 : index
    %c0_12 = arith.constant 0 : index
    %25 = vector.load %arg5[%c0_10, %c0_11, %c0_12] : memref<1x4x128xf32, #tpu.memory_space<vmem>>, vector<1x4x128xf32>
    tpu.vector_store %arg5[%c0_10, %c0_11, %c0_12], %24 {strides = array<i32>} : memref<1x4x128xf32, #tpu.memory_space<vmem>>, vector<1x4x128xf32>,
    return
  }
  func.func @transform_0(%arg0: i32, %arg1: i32) -> (i32, i32, i32) {
    %c0_i32 = arith.constant 0 : i32
    %c0_i32_0 = arith.constant 0 : i32
    return %arg0, %c0_i32, %arg1 : i32, i32, i32
  }
  func.func @transform_1(%arg0: i32, %arg1: i32) -> (i32, i32) {
    %c0_i32 = arith.constant 0 : i32
    %c0_i32_0 = arith.constant 0 : i32
    %c0_i32_1 = arith.constant 0 : i32
    return %c0_i32, %c0_i32_0 : i32, i32
  }
  func.func @transform_2(%arg0: i32, %arg1: i32) -> (i32, i32) {
    %c0_i32 = arith.constant 0 : i32
    %c0_i32_0 = arith.constant 0 : i32
    %c0_i32_1 = arith.constant 0 : i32
    return %c0_i32, %c0_i32_0 : i32, i32
  }
  func.func @transform_3(%arg0: i32, %arg1: i32) -> (i32, i32, i32) {
    %c0_i32 = arith.constant 0 : i32
    %c0_i32_0 = arith.constant 0 : i32
    return %arg0, %c0_i32, %arg1 : i32, i32, i32
  }
}

</mosaic_0001>

<bundles_post_ra>
// kernel: layer_norm.1
= control target key start
LH: loop header
LB: loop body
LE: loop exit
PB: predicated region body
PF: predicated region fallthrough
CT: control target
= control target key end

     0   :  { %s442_s12 = smov 0   ;;  %s444_s13 = smov 0   ;;  %s506_s0 = inlined_call_operand.vmem [shape: f32[2,4,256], index: 0, kind: input, shape index: {}]   ;;  %s507_s1 = inlined_call_operand.vmem [shape: f32[4,1], index: 1, kind: input, shape index: {}]   ;;  %s508_s2 = inlined_call_operand.vmem [shape: f32[4,1], index: 2, kind: input, shape index: {}]   ;;  %s509_s3 = inlined_call_operand.vmem [shape: f32[2,4,256], index: 3, kind: output, shape index: {}]  }
   0x1   :  { %s446_s14 = smov 0   ;;  %s448_s15 = smov 0  }
   0x2   :  { %s450_s16 = smov 0  }
   0x3 LB: > { %s22_s17 = sadd.s32 1, %s411_s14  ;;  %s25_s18 = sadd.s32 1, %s415_s15  ;;  %s419_s16 = sphi %s450_s16, %s13_s16   ;;  %s415_s15 = sphi %s448_s15, %s513_s15   ;;  %s411_s14 = sphi %s446_s14, %s512_s14   ;;  %s407_s13 = sphi %s444_s13, %s511_s13   ;;  %s403_s12 = sphi %s442_s12, %s510_s12  }
   0x4   : > { %p23_p0 = scmp.ge.s32.totalorder %s22_s17, 2  ;;  %p330_p1 = scmp.ge.s32.totalorder %s419_s16, 1 }
   0x5   : > { %p156_p2 = scmp.lt.s32.totalorder %s419_s16, 5 }
   0x6   : > { %s515_s17 = smov (%p23_p0, %s22_s17), 0  ;;  %s517_s18 = smov (!%p23_p0, %s25_s18), %s415_s15 }
   0x7   : > { %p157_p3 = pnand %p330_p1, %p156_p2  ;;  %p27_p4 = scmp.ge.s32.totalorder %s517_s18, 2 }
   0x8   : > { %v224_v0 = vld [vmem:[%s507_s1] sm:$0xf] (!%p157_p3)  ;;  %v421_v1 = vmov (!%p157_p3), 0   ;;  %p186_p5 = scmp.lt.s32.totalorder (!%p157_p3), %s407_s13, 1  ;;  %p188_p6 = scmp.lt.s32.totalorder (!%p157_p3), %s403_s12, 1  ;;  %vm203_vm0 = vcmask (!%p157_p3), 1043456  }
   0x9   : > { %s519_s18 = smov (%p27_p4, %s517_s18), 0  ;;  %160 = sbr.rel (%p157_p3) target bundleno = 146 (0x92), region = 32 }
   0xa   : > { %378 = vset.pattern.permute.xlu0 (!%p157_p3), %v421_v1  ;;  %v225_v2 = vld [vmem:[%s508_s2] sm:$0xf] (!%p157_p3) }
   0xb   : > { %229 = vperm.xlu0 (!%p157_p3), %378, %v224_v0  }
   0xf   : > { %235 = vperm.xlu0 (!%p157_p3), %378, %v225_v2  }
  0x10   : > { %s521_s13 = smov (!%p186_p5, %s407_s13), 1  ;;  %s523_s12 = smov (!%p188_p6, %s403_s12), 1 }
  0x11   : > { %s331_s23 = sshll.u32 %s521_s13, 1 }
  0x12   : > { %s478_s24 = sadd.s32 %s331_s23, %s523_s12 }
  0x13   : > { %s332_s25 = sshll.u32 %s478_s24, 2 }
  0x14   : > { %s193_s28 = scalar_lea.vmem %s506_s0, %s332_s25  ;;  %s201_s4 = scalar_lea.vmem %s509_s3, %s332_s25 }
  0x15   : > { %v202_v3 = vld [vmem:[%s193_s28] sm:$0xf] }
  0x16   : > { %v204_v4 = vsel %vm203_vm0, %v202_v3, 0.0 }
  0x17   : > { %v205_v5 = vrot.slane %v204_v4, 4 }
  0x19   : > { %v206_v6 = vadd.f32 %v205_v5, %v204_v4 }
  0x1b   : > { %v207_v7 = vrot.slane %v206_v6, 2 }
  0x1d   : > { %v208_v8 = vadd.f32 %v207_v7, %v206_v6 }
  0x1f   : > { %v209_v9 = vrot.slane %v208_v8, 1 }
  0x21   : > { %v210_v10 = vadd.f32 %v209_v9, %v208_v8 }
  0x23   : > { %v211_v11 = vmul.f32 0.25, %v210_v10 }
  0x25   : > { %v212_v12 = vsub.f32 %v202_v3, %v211_v11 }
  0x27   : > { %v213_v13 = vmul.f32 %v212_v12, %v212_v12 }
  0x29   : > { %v214_v14 = vsel %vm203_vm0, %v213_v13, 0.0 }
  0x2a   : > { %v215_v15 = vrot.slane %v214_v14, 4 }
  0x2c   : > { %v216_v16 = vadd.f32 %v215_v15, %v214_v14 }
  0x2e   : > { %v217_v17 = vrot.slane %v216_v16, 2 }
  0x30   : > { %v218_v18 = vadd.f32 %v217_v17, %v216_v16 }
  0x32   : > { %v219_v19 = vrot.slane %v218_v18, 1 }
  0x34   : > { %v220_v20 = vadd.f32 %v219_v19, %v218_v18 }
  0x36   : > { %v221_v21 = vmul.f32 0.25, %v220_v20 }
  0x38   : > { %v222_v22 = vadd.f32 1e-05, %v221_v21 }
  0x3a   : > { %379 = vrsqrt.f32 %v222_v22 }
  0x44   : > { %v380_v23 = vpop.eup %379 }
  0x45   : > { %v226_v24 = vmul.f32 %v380_v23, %v212_v12 }
  0x8a   : > { %v230_v25 = vpop.permute.xlu0 %229 }
  0x8b   : > { %v232_v26 = vmul.f32 %v230_v25, %v226_v24 }
  0x8e   : > { %v236_v27 = vpop.permute.xlu0 %235 }
  0x8f   : > { %v238_v28 = vadd.f32 %v236_v27, %v232_v26 }
  0x91   : > { %239 = vst [vmem:[%s201_s4] sm:$0xf] %v238_v28 }
  0x92 PF: > { %s13_s16 = sadd.s32 1, %s419_s16   ;;  %s510_s12 = smov %s411_s14 }
  0x93   : > { %p10_p7 = scmp.ge.s32.totalorder %s13_s16, 6   ;;  %s511_s13 = smov %s415_s15 }
  0x94   : > { %s512_s14 = smov %s515_s17  ;;  %s513_s15 = smov %s519_s18 }
  0x95   :  { %12 = sbr.rel (!%p10_p7) target bundleno = 3 (0x3), region = 62 }

</bundles_post_ra>
